<compile_context>
chip_gen: v6e
topology: v6e:2x2x1
jax: 0.10.0
libtpu: 0.0.40
codegen_flags: <defaults>
</compile_context>

<pallas_src>
import jax
import jax.numpy as jnp
from jax.experimental import pallas as pl
from jax.experimental.pallas import tpu as pltpu


def _mpdist_kernel(alpha_ref, beta_ref,
                   img_e_ref, img_o_ref, txt_e_ref, txt_o_ref,
                   out_ref,
                   x2e_scr, x2o_scr):
    """Computes one (tn, tm) tile of the pooled output.

    img_e/img_o hold the even/odd image rows of this row-tile, txt_e/txt_o the
    even/odd text rows of this column-tile.  Each 2x2 pooling window of the
    full sigmoid(alpha*cdist+beta) matrix corresponds to one entry in each of
    the four (tn, tm) quadrants computed below; their mean is the pooled value.
    """
    alpha = alpha_ref[0]
    beta = beta_ref[0]

    xe = img_e_ref[...]                      # (tn, D) image rows 0,2,4,...
    xo = img_o_ref[...]                      # (tn, D) image rows 1,3,5,...
    ye = txt_e_ref[...]                      # (tm, D) text rows 0,2,4,...
    yo = txt_o_ref[...]                      # (tm, D) text rows 1,3,5,...

    # ||x||^2 depends only on the row-tile index i -> cache across the inner
    # (j) grid axis instead of redoing the cross-lane reduce every step.
    @pl.when(pl.program_id(1) == 0)
    def _():
        xef = xe.astype(jnp.float32)
        xof = xo.astype(jnp.float32)
        x2e_scr[...] = jnp.sum(xef * xef, axis=-1, keepdims=True)
        x2o_scr[...] = jnp.sum(xof * xof, axis=-1, keepdims=True)

    yef = ye.astype(jnp.float32)
    yof = yo.astype(jnp.float32)
    y2e = jnp.sum(yef * yef, axis=-1)[None, :]      # (1, tm)
    y2o = jnp.sum(yof * yof, axis=-1)[None, :]      # (1, tm)

    x2e = x2e_scr[...]                              # (tn, 1)
    x2o = x2o_scr[...]

    def _quadrant(x, x2, y, y2):
        # cdist(p=2) via the matmul identity; MXU runs in the input dtype,
        # accumulation is f32.
        xy = jax.lax.dot_general(x, y, (((1,), (1,)), ((), ())),
                                 preferred_element_type=jnp.float32)
        d2 = jnp.maximum(x2 + y2 - 2.0 * xy, 0.0)
        dist = jnp.sqrt(d2)
        z = alpha * dist + beta
        # numerically stable sigmoid (no inf intermediates for large |z|)
        e = jnp.exp(-jnp.abs(z))
        return jnp.where(z >= 0.0, 1.0, e) / (1.0 + e)

    acc = _quadrant(xe, x2e, ye, y2e)
    acc = acc + _quadrant(xe, x2e, yo, y2o)
    acc = acc + _quadrant(xo, x2o, ye, y2e)
    acc = acc + _quadrant(xo, x2o, yo, y2o)
    out_ref[...] = (acc * 0.25).astype(out_ref.dtype)


def _choose_tile(dim, quantum, target):
    """Largest tile <= target that divides `dim` and is a multiple of `quantum`;
    falls back to the full extent (always a legal block shape)."""
    if dim <= target:
        return dim
    t = (target // quantum) * quantum
    while t >= quantum:
        if dim % t == 0:
            return t
        t -= quantum
    return dim


def mpdistance_forward(img_embs, txt_embs, alpha, beta):
    """Pallas implementation of MPdistance.forward for 2-D embeddings
    (avg_pool = nn.AvgPool2d(kernel_size=2, stride=2))."""
    N, D = img_embs.shape
    M, D2 = txt_embs.shape
    assert D == D2
    assert N % 2 == 0 and M % 2 == 0, "AvgPool2d(2,2) requires even N and M"
    No, Mo = N // 2, M // 2

    # Fold the 2x2 pooling into the data layout (one-time XLA strided slices).
    img_e, img_o = img_embs[0::2], img_embs[1::2]    # (No, D) each
    txt_e, txt_o = txt_embs[0::2], txt_embs[1::2]    # (Mo, D) each

    alpha = jnp.asarray(alpha, jnp.float32).reshape((1,))
    beta = jnp.asarray(beta, jnp.float32).reshape((1,))

    # Tile sizes in *pooled* coordinates (pre-pool tile is 2x in each dim).
    # Row tiles: multiples of 8 sublanes; col tiles: multiples of 128 lanes so
    # the output write-back is lane-dense.  Sized well under the 32 MiB scoped
    # VMEM budget that also holds on v7x.
    tn = _choose_tile(No, 8, 256)
    tm = _choose_tile(Mo, 128, 256)
    grid = (No // tn, Mo // tm)

    itemsize = jnp.dtype(img_embs.dtype).itemsize
    cost = pl.CostEstimate(
        flops=2 * N * M * D + 4 * No * Mo,
        transcendentals=2 * N * M,                       # sqrt + exp per pair
        bytes_accessed=(N + M) * D * itemsize + No * Mo * 4)

    return pl.pallas_call(
        _mpdist_kernel,
        out_shape=jax.ShapeDtypeStruct((No, Mo), jnp.float32),
        grid=grid,
        in_specs=[
            pl.BlockSpec(memory_space=pltpu.MemorySpace.SMEM),   # alpha (1,)
            pl.BlockSpec(memory_space=pltpu.MemorySpace.SMEM),   # beta  (1,)
            pl.BlockSpec((tn, D), lambda i, j: (i, 0)),          # img even rows
            pl.BlockSpec((tn, D), lambda i, j: (i, 0)),          # img odd rows
            pl.BlockSpec((tm, D), lambda i, j: (j, 0)),          # txt even rows
            pl.BlockSpec((tm, D), lambda i, j: (j, 0)),          # txt odd rows
        ],
        out_specs=pl.BlockSpec((tn, tm), lambda i, j: (i, j)),
        scratch_shapes=[pltpu.VMEM((tn, 1), jnp.float32),        # ||x_even||^2
                        pltpu.VMEM((tn, 1), jnp.float32)],       # ||x_odd||^2
        compiler_params=pltpu.CompilerParams(
            dimension_semantics=("parallel", "arbitrary"),
            vmem_limit_bytes=32 * 1024 * 1024),
        cost_estimate=cost,
    )(alpha, beta, img_e, img_o, txt_e, txt_o)


def _reference(img_embs, txt_embs, alpha, beta):
    # Pure-JAX reference mirroring the PyTorch forward (cdist -> sigmoid -> 2x2 avg pool).
    diff = img_embs[:, None, :] - txt_embs[None, :, :]
    dist = jnp.sqrt(jnp.sum(diff * diff, axis=-1))
    sig = jax.nn.sigmoid(alpha * dist + beta)
    N, M = sig.shape
    return sig.reshape(N // 2, 2, M // 2, 2).mean(axis=(1, 3))


if __name__ == "__main__":
    key = jax.random.PRNGKey(0)
    k1, k2 = jax.random.split(key)

    N, M, D = 16, 16, 32
    img_embs = jax.random.normal(k1, (N, D), dtype=jnp.float32)
    txt_embs = jax.random.normal(k2, (M, D), dtype=jnp.float32)

    # Parameters as in __init__: alpha = ones(1), beta = zeros(1).
    alpha = jnp.ones((1,), jnp.float32)
    beta = jnp.zeros((1,), jnp.float32)

    out = mpdistance_forward(img_embs, txt_embs, alpha, beta)
    out = jax.block_until_ready(out)

    ref = _reference(img_embs, txt_embs, alpha[0], beta[0])
    assert out.shape == (N // 2, M // 2)
    assert jnp.allclose(out, ref, atol=1e-5, rtol=1e-5), (out, ref)

    print("KERNEL_OK")
</pallas_src>

<mosaic_0001>
module attributes {stable_mosaic.version = 11 : i64} {
  func.func @_mpdist_kernel(%arg0: i32, %arg1: i32, %arg2: memref<1xf32, #tpu.memory_space<smem>>, %arg3: memref<1xf32, #tpu.memory_space<smem>>, %arg4: memref<8x32xf32, #tpu.memory_space<vmem>>, %arg5: memref<8x32xf32, #tpu.memory_space<vmem>>, %arg6: memref<8x32xf32, #tpu.memory_space<vmem>>, %arg7: memref<8x32xf32, #tpu.memory_space<vmem>>, %arg8: memref<8x8xf32, #tpu.memory_space<vmem>>, %arg9: memref<8x1xf32, #tpu.memory_space<vmem>>, %arg10: memref<8x1xf32, #tpu.memory_space<vmem>>) attributes {dimension_semantics = [#tpu.dimension_semantics<parallel>, #tpu.dimension_semantics<arbitrary>], iteration_bounds = array<i64: 1, 1>, scalar_prefetch = 0 : i64, scratch_operands = 2 : i64, tpu.core_type = #tpu.core_type<tc>, window_params = [{transform_indices = @transform_0, window_bounds = array<i64: 1>}, {transform_indices = @transform_1, window_bounds = array<i64: 1>}, {transform_indices = @transform_2, window_bounds = array<i64: 8, 32>}, {transform_indices = @transform_3, window_bounds = array<i64: 8, 32>}, {transform_indices = @transform_4, window_bounds = array<i64: 8, 32>}, {transform_indices = @transform_5, window_bounds = array<i64: 8, 32>}, {transform_indices = @transform_6, window_bounds = array<i64: 8, 8>}]} {
    %c0 = arith.constant 0 : index
    %0 = memref.load %arg2[%c0] : memref<1xf32, #tpu.memory_space<smem>>
    %c0_0 = arith.constant 0 : index
    %1 = memref.load %arg3[%c0_0] : memref<1xf32, #tpu.memory_space<smem>>
    %c0_1 = arith.constant 0 : index
    %c0_2 = arith.constant 0 : index
    %2 = vector.load %arg4[%c0_1, %c0_2] : memref<8x32xf32, #tpu.memory_space<vmem>>, vector<8x32xf32>
    %c0_3 = arith.constant 0 : index
    %c0_4 = arith.constant 0 : index
    %3 = vector.load %arg5[%c0_3, %c0_4] : memref<8x32xf32, #tpu.memory_space<vmem>>, vector<8x32xf32>
    %c0_5 = arith.constant 0 : index
    %c0_6 = arith.constant 0 : index
    %4 = vector.load %arg6[%c0_5, %c0_6] : memref<8x32xf32, #tpu.memory_space<vmem>>, vector<8x32xf32>
    %c0_7 = arith.constant 0 : index
    %c0_8 = arith.constant 0 : index
    %5 = vector.load %arg7[%c0_7, %c0_8] : memref<8x32xf32, #tpu.memory_space<vmem>>, vector<8x32xf32>
    %c0_i32 = arith.constant 0 : i32
    %6 = arith.cmpi eq, %arg1, %c0_i32 : i32
    %7 = arith.extui %6 : i1 to i32
    %c0_i32_9 = arith.constant 0 : i32
    %8 = arith.cmpi ne, %7, %c0_i32_9 : i32
    scf.if %8 {
      %123 = arith.mulf %2, %2 : vector<8x32xf32>
      %cst_46 = arith.constant dense<0.000000e+00> : vector<8xf32>
      %124 = vector.multi_reduction <add>, %123, %cst_46 [1] : vector<8x32xf32> to vector<8xf32>
      %125 = vector.shape_cast %124 : vector<8xf32> to vector<8x1xf32>
      %c0_47 = arith.constant 0 : index
      %c0_48 = arith.constant 0 : index
      %126 = vector.load %arg9[%c0_47, %c0_48] : memref<8x1xf32, #tpu.memory_space<vmem>>, vector<8x1xf32>
      tpu.vector_store %arg9[%c0_47, %c0_48], %125 {strides = array<i32>} : memref<8x1xf32, #tpu.memory_space<vmem>>, vector<8x1xf32>,
      %127 = arith.mulf %3, %3 : vector<8x32xf32>
      %cst_49 = arith.constant dense<0.000000e+00> : vector<8xf32>
      %128 = vector.multi_reduction <add>, %127, %cst_49 [1] : vector<8x32xf32> to vector<8xf32>
      %129 = vector.shape_cast %128 : vector<8xf32> to vector<8x1xf32>
      %c0_50 = arith.constant 0 : index
      %c0_51 = arith.constant 0 : index
      %130 = vector.load %arg10[%c0_50, %c0_51] : memref<8x1xf32, #tpu.memory_space<vmem>>, vector<8x1xf32>
      tpu.vector_store %arg10[%c0_50, %c0_51], %129 {strides = array<i32>} : memref<8x1xf32, #tpu.memory_space<vmem>>, vector<8x1xf32>,
    } else {
    }
    %9 = arith.mulf %4, %4 : vector<8x32xf32>
    %cst = arith.constant dense<0.000000e+00> : vector<8xf32>
    %10 = vector.multi_reduction <add>, %9, %cst [1] : vector<8x32xf32> to vector<8xf32>
    %11 = vector.shape_cast %10 : vector<8xf32> to vector<1x8xf32>
    %12 = arith.mulf %5, %5 : vector<8x32xf32>
    %cst_10 = arith.constant dense<0.000000e+00> : vector<8xf32>
    %13 = vector.multi_reduction <add>, %12, %cst_10 [1] : vector<8x32xf32> to vector<8xf32>
    %14 = vector.shape_cast %13 : vector<8xf32> to vector<1x8xf32>
    %c0_11 = arith.constant 0 : index
    %c0_12 = arith.constant 0 : index
    %15 = vector.load %arg9[%c0_11, %c0_12] : memref<8x1xf32, #tpu.memory_space<vmem>>, vector<8x1xf32>
    %c0_13 = arith.constant 0 : index
    %c0_14 = arith.constant 0 : index
    %16 = vector.load %arg10[%c0_13, %c0_14] : memref<8x1xf32, #tpu.memory_space<vmem>>, vector<8x1xf32>
    %cst_15 = arith.constant dense<0.000000e+00> : vector<8x8xf32>
    %17 = tpu.matmul %2, %4, %cst_15 {dimension_numbers = #tpu.dot_dimension_numbers<[1], [1], [0], [0], [0, 0, 1, 0], [], []>} : vector<8x32xf32>, vector<8x32xf32>, vector<8x8xf32> -> vector<8x8xf32>
    %18 = vector.broadcast %15 : vector<8x1xf32> to vector<8x8xf32>
    %19 = vector.broadcast %11 : vector<1x8xf32> to vector<8x8xf32>
    %20 = arith.addf %18, %19 : vector<8x8xf32>
    %cst_16 = arith.constant 2.000000e+00 : f32
    %21 = vector.broadcast %cst_16 : f32 to vector<8x8xf32>
    %22 = arith.mulf %21, %17 : vector<8x8xf32>
    %23 = arith.subf %20, %22 : vector<8x8xf32>
    %cst_17 = arith.constant 0.000000e+00 : f32
    %24 = vector.broadcast %cst_17 : f32 to vector<8x8xf32>
    %25 = arith.maximumf %23, %24 : vector<8x8xf32>
    %26 = math.sqrt %25 : vector<8x8xf32>
    %27 = vector.broadcast %0 : f32 to vector<8x8xf32>
    %28 = arith.mulf %27, %26 : vector<8x8xf32>
    %29 = vector.broadcast %1 : f32 to vector<8x8xf32>
    %30 = arith.addf %28, %29 : vector<8x8xf32>
    %31 = math.absf %30 : vector<8x8xf32>
    %cst_18 = arith.constant 0.000000e+00 : f32
    %32 = vector.broadcast %cst_18 : f32 to vector<8x8xf32>
    %33 = arith.subf %32, %31 : vector<8x8xf32>
    %34 = math.exp %33 : vector<8x8xf32>
    %cst_19 = arith.constant 0.000000e+00 : f32
    %35 = vector.broadcast %cst_19 : f32 to vector<8x8xf32>
    %36 = arith.cmpf oge, %30, %35 : vector<8x8xf32>
    %cst_20 = arith.constant 1.000000e+00 : f32
    %37 = vector.broadcast %cst_20 : f32 to vector<8x8xf32>
    %38 = arith.select %36, %37, %34 : vector<8x8xi1>, vector<8x8xf32>
    %cst_21 = arith.constant 1.000000e+00 : f32
    %39 = vector.broadcast %cst_21 : f32 to vector<8x8xf32>
    %40 = arith.addf %39, %34 : vector<8x8xf32>
    %41 = arith.divf %38, %40 : vector<8x8xf32>
    %cst_22 = arith.constant dense<0.000000e+00> : vector<8x8xf32>
    %42 = tpu.matmul %2, %5, %cst_22 {dimension_numbers = #tpu.dot_dimension_numbers<[1], [1], [0], [0], [0, 0, 1, 0], [], []>} : vector<8x32xf32>, vector<8x32xf32>, vector<8x8xf32> -> vector<8x8xf32>
    %43 = vector.broadcast %15 : vector<8x1xf32> to vector<8x8xf32>
    %44 = vector.broadcast %14 : vector<1x8xf32> to vector<8x8xf32>
    %45 = arith.addf %43, %44 : vector<8x8xf32>
    %cst_23 = arith.constant 2.000000e+00 : f32
    %46 = vector.broadcast %cst_23 : f32 to vector<8x8xf32>
    %47 = arith.mulf %46, %42 : vector<8x8xf32>
    %48 = arith.subf %45, %47 : vector<8x8xf32>
    %cst_24 = arith.constant 0.000000e+00 : f32
    %49 = vector.broadcast %cst_24 : f32 to vector<8x8xf32>
    %50 = arith.maximumf %48, %49 : vector<8x8xf32>
    %51 = math.sqrt %50 : vector<8x8xf32>
    %52 = vector.broadcast %0 : f32 to vector<8x8xf32>
    %53 = arith.mulf %52, %51 : vector<8x8xf32>
    %54 = vector.broadcast %1 : f32 to vector<8x8xf32>
    %55 = arith.addf %53, %54 : vector<8x8xf32>
    %56 = math.absf %55 : vector<8x8xf32>
    %cst_25 = arith.constant 0.000000e+00 : f32
    %57 = vector.broadcast %cst_25 : f32 to vector<8x8xf32>
    %58 = arith.subf %57, %56 : vector<8x8xf32>
    %59 = math.exp %58 : vector<8x8xf32>
    %cst_26 = arith.constant 0.000000e+00 : f32
    %60 = vector.broadcast %cst_26 : f32 to vector<8x8xf32>
    %61 = arith.cmpf oge, %55, %60 : vector<8x8xf32>
    %cst_27 = arith.constant 1.000000e+00 : f32
    %62 = vector.broadcast %cst_27 : f32 to vector<8x8xf32>
    %63 = arith.select %61, %62, %59 : vector<8x8xi1>, vector<8x8xf32>
    %cst_28 = arith.constant 1.000000e+00 : f32
    %64 = vector.broadcast %cst_28 : f32 to vector<8x8xf32>
    %65 = arith.addf %64, %59 : vector<8x8xf32>
    %66 = arith.divf %63, %65 : vector<8x8xf32>
    %67 = arith.addf %41, %66 : vector<8x8xf32>
    %cst_29 = arith.constant dense<0.000000e+00> : vector<8x8xf32>
    %68 = tpu.matmul %3, %4, %cst_29 {dimension_numbers = #tpu.dot_dimension_numbers<[1], [1], [0], [0], [0, 0, 1, 0], [], []>} : vector<8x32xf32>, vector<8x32xf32>, vector<8x8xf32> -> vector<8x8xf32>
    %69 = vector.broadcast %16 : vector<8x1xf32> to vector<8x8xf32>
    %70 = vector.broadcast %11 : vector<1x8xf32> to vector<8x8xf32>
    %71 = arith.addf %69, %70 : vector<8x8xf32>
    %cst_30 = arith.constant 2.000000e+00 : f32
    %72 = vector.broadcast %cst_30 : f32 to vector<8x8xf32>
    %73 = arith.mulf %72, %68 : vector<8x8xf32>
    %74 = arith.subf %71, %73 : vector<8x8xf32>
    %cst_31 = arith.constant 0.000000e+00 : f32
    %75 = vector.broadcast %cst_31 : f32 to vector<8x8xf32>
    %76 = arith.maximumf %74, %75 : vector<8x8xf32>
    %77 = math.sqrt %76 : vector<8x8xf32>
    %78 = vector.broadcast %0 : f32 to vector<8x8xf32>
    %79 = arith.mulf %78, %77 : vector<8x8xf32>
    %80 = vector.broadcast %1 : f32 to vector<8x8xf32>
    %81 = arith.addf %79, %80 : vector<8x8xf32>
    %82 = math.absf %81 : vector<8x8xf32>
    %cst_32 = arith.constant 0.000000e+00 : f32
    %83 = vector.broadcast %cst_32 : f32 to vector<8x8xf32>
    %84 = arith.subf %83, %82 : vector<8x8xf32>
    %85 = math.exp %84 : vector<8x8xf32>
    %cst_33 = arith.constant 0.000000e+00 : f32
    %86 = vector.broadcast %cst_33 : f32 to vector<8x8xf32>
    %87 = arith.cmpf oge, %81, %86 : vector<8x8xf32>
    %cst_34 = arith.constant 1.000000e+00 : f32
    %88 = vector.broadcast %cst_34 : f32 to vector<8x8xf32>
    %89 = arith.select %87, %88, %85 : vector<8x8xi1>, vector<8x8xf32>
    %cst_35 = arith.constant 1.000000e+00 : f32
    %90 = vector.broadcast %cst_35 : f32 to vector<8x8xf32>
    %91 = arith.addf %90, %85 : vector<8x8xf32>
    %92 = arith.divf %89, %91 : vector<8x8xf32>
    %93 = arith.addf %67, %92 : vector<8x8xf32>
    %cst_36 = arith.constant dense<0.000000e+00> : vector<8x8xf32>
    %94 = tpu.matmul %3, %5, %cst_36 {dimension_numbers = #tpu.dot_dimension_numbers<[1], [1], [0], [0], [0, 0, 1, 0], [], []>} : vector<8x32xf32>, vector<8x32xf32>, vector<8x8xf32> -> vector<8x8xf32>
    %95 = vector.broadcast %16 : vector<8x1xf32> to vector<8x8xf32>
    %96 = vector.broadcast %14 : vector<1x8xf32> to vector<8x8xf32>
    %97 = arith.addf %95, %96 : vector<8x8xf32>
    %cst_37 = arith.constant 2.000000e+00 : f32
    %98 = vector.broadcast %cst_37 : f32 to vector<8x8xf32>
    %99 = arith.mulf %98, %94 : vector<8x8xf32>
    %100 = arith.subf %97, %99 : vector<8x8xf32>
    %cst_38 = arith.constant 0.000000e+00 : f32
    %101 = vector.broadcast %cst_38 : f32 to vector<8x8xf32>
    %102 = arith.maximumf %100, %101 : vector<8x8xf32>
    %103 = math.sqrt %102 : vector<8x8xf32>
    %104 = vector.broadcast %0 : f32 to vector<8x8xf32>
    %105 = arith.mulf %104, %103 : vector<8x8xf32>
    %106 = vector.broadcast %1 : f32 to vector<8x8xf32>
    %107 = arith.addf %105, %106 : vector<8x8xf32>
    %108 = math.absf %107 : vector<8x8xf32>
    %cst_39 = arith.constant 0.000000e+00 : f32
    %109 = vector.broadcast %cst_39 : f32 to vector<8x8xf32>
    %110 = arith.subf %109, %108 : vector<8x8xf32>
    %111 = math.exp %110 : vector<8x8xf32>
    %cst_40 = arith.constant 0.000000e+00 : f32
    %112 = vector.broadcast %cst_40 : f32 to vector<8x8xf32>
    %113 = arith.cmpf oge, %107, %112 : vector<8x8xf32>
    %cst_41 = arith.constant 1.000000e+00 : f32
    %114 = vector.broadcast %cst_41 : f32 to vector<8x8xf32>
    %115 = arith.select %113, %114, %111 : vector<8x8xi1>, vector<8x8xf32>
    %cst_42 = arith.constant 1.000000e+00 : f32
    %116 = vector.broadcast %cst_42 : f32 to vector<8x8xf32>
    %117 = arith.addf %116, %111 : vector<8x8xf32>
    %118 = arith.divf %115, %117 : vector<8x8xf32>
    %119 = arith.addf %93, %118 : vector<8x8xf32>
    %cst_43 = arith.constant 2.500000e-01 : f32
    %120 = vector.broadcast %cst_43 : f32 to vector<8x8xf32>
    %121 = arith.mulf %119, %120 : vector<8x8xf32>
    %c0_44 = arith.constant 0 : index
    %c0_45 = arith.constant 0 : index
    %122 = vector.load %arg8[%c0_44, %c0_45] : memref<8x8xf32, #tpu.memory_space<vmem>>, vector<8x8xf32>
    tpu.vector_store %arg8[%c0_44, %c0_45], %121 {strides = array<i32>} : memref<8x8xf32, #tpu.memory_space<vmem>>, vector<8x8xf32>,
    return
  }
  func.func @transform_0(%arg0: i32, %arg1: i32) -> i32 {
    %c0_i32 = arith.constant 0 : i32
    %c0_i32_0 = arith.constant 0 : i32
    return %c0_i32 : i32
  }
  func.func @transform_1(%arg0: i32, %arg1: i32) -> i32 {
    %c0_i32 = arith.constant 0 : i32
    %c0_i32_0 = arith.constant 0 : i32
    return %c0_i32 : i32
  }
  func.func @transform_2(%arg0: i32, %arg1: i32) -> (i32, i32) {
    %c0_i32 = arith.constant 0 : i32
    %c0_i32_0 = arith.constant 0 : i32
    return %arg0, %c0_i32 : i32, i32
  }
  func.func @transform_3(%arg0: i32, %arg1: i32) -> (i32, i32) {
    %c0_i32 = arith.constant 0 : i32
    %c0_i32_0 = arith.constant 0 : i32
    return %arg0, %c0_i32 : i32, i32
  }
  func.func @transform_4(%arg0: i32, %arg1: i32) -> (i32, i32) {
    %c0_i32 = arith.constant 0 : i32
    %c0_i32_0 = arith.constant 0 : i32
    return %arg1, %c0_i32 : i32, i32
  }
  func.func @transform_5(%arg0: i32, %arg1: i32) -> (i32, i32) {
    %c0_i32 = arith.constant 0 : i32
    %c0_i32_0 = arith.constant 0 : i32
    return %arg1, %c0_i32 : i32, i32
  }
  func.func @transform_6(%arg0: i32, %arg1: i32) -> (i32, i32) {
    %c0_i32 = arith.constant 0 : i32
    return %arg0, %arg1 : i32, i32
  }
}

</mosaic_0001>

<bundles_post_ra>
// kernel: tpu_custom_call.1
= control target key start
LH: loop header
LB: loop body
LE: loop exit
PB: predicated region body
PF: predicated region fallthrough
CT: control target
= control target key end

     0   :  { %13 = vsyncpa [#allocation7], 0  ;;  %s774_s0 = inlined_call_operand.<no memory space> [shape: f32[1], index: 0, kind: input, shape index: {}]   ;;  %s775_s1 = inlined_call_operand.<no memory space> [shape: f32[1], index: 1, kind: input, shape index: {}]   ;;  %s776_s2 = inlined_call_operand.hbm [shape: f32[8,32], index: 2, kind: input, shape index: {}]   ;;  %s777_s3 = inlined_call_operand.hbm [shape: f32[8,32], index: 3, kind: input, shape index: {}]   ;;  %s778_s4 = inlined_call_operand.hbm [shape: f32[8,32], index: 4, kind: input, shape index: {}]   ;;  %s779_s5 = inlined_call_operand.vmem [shape: f32[8,32], index: 5, kind: input, shape index: {}]   ;;  %s780_s6 = inlined_call_operand.hbm [shape: f32[8,8], index: 6, kind: output, shape index: {}]  }
   0x1   :  { %14 = vsyncpa [#allocation10], 0 }
   0x2   :  { %15 = vsyncpa [#allocation8], 0  ;;  %s695_s21 = smov [#allocation9]   ;;  %s696_s23 = smov [#allocation6]  }
   0x3   :  { %s36_s22 = sshll.u32 %s695_s21, 4  ;;  %s26_s24 = sshll.u32 %s696_s23, 4  ;;  %s37_s22 = int_to_ptr.vmem [resolvable:$true] %s36_s22  ;;  %s27_s24 = int_to_ptr.vmem [resolvable:$true] %s26_s24 }
   0x4   :  { %s617_s25 = scalar_lea.vmem %s37_s22, 128  ;;  %p622_p1 = scmp.lt.s32.totalorder %s37_s22, %s37_s22 }
   0x5   :  { %p618_p0 = scmp.ne.s32.totalorder %s37_s22, %s617_s25  ;;  %p623_p2 = scmp.lt.s32.totalorder %s617_s25, %s617_s25 }
   0x7   :  { %p624_p3 = por %p623_p2, %p622_p1 }
   0x9   :  { %p625_p4 = pnand %p624_p3, %p618_p0 }
   0xb   :  { %628 = shalt.err (!%p625_p4)
}
   0xc   :  { %39 = dma.hbm_to_vmem [thread:$0]  %s777_s3, 128, %s37_s22, [#allocation10]  }
   0xd   :  { %s637_s28 = scalar_lea.vmem %s27_s24, 128  ;;  %p642_p6 = scmp.lt.s32.totalorder %s27_s24, %s27_s24 }
   0xe   :  { %p638_p5 = scmp.ne.s32.totalorder %s27_s24, %s637_s28  ;;  %p643_p7 = scmp.lt.s32.totalorder %s637_s28, %s637_s28 }
  0x10   :  { %p644_p8 = por %p643_p7, %p642_p6 }
  0x12   :  { %p645_p9 = pnand %p644_p8, %p638_p5 }
  0x14   :  { %648 = shalt.err (!%p645_p9)
}
  0x15   :  { %29 = dma.hbm_to_vmem [thread:$0]  %s776_s2, 128, %s27_s24, [#allocation7]  }
  0x16   :  { %s697_s7 = smov [#allocation11]  }
  0x17   :  { %s46_s8 = sshll.u32 %s697_s7, 4  ;;  %s47_s8 = int_to_ptr.vmem [resolvable:$true] %s46_s8 }
  0x18   :  { %s657_s9 = scalar_lea.vmem %s47_s8, 128  ;;  %p662_p11 = scmp.lt.s32.totalorder %s47_s8, %s47_s8 }
  0x19   :  { %p658_p10 = scmp.ne.s32.totalorder %s47_s8, %s657_s9  ;;  %p663_p12 = scmp.lt.s32.totalorder %s657_s9, %s657_s9 }
  0x1b   :  { %p664_p13 = por %p663_p12, %p662_p11 }
  0x1d   :  { %p665_p0 = pnand %p664_p13, %p658_p10 }
  0x1f   :  { %668 = shalt.err (!%p665_p0)
}
  0x20   :  { %49 = dma.hbm_to_vmem [thread:$0]  %s778_s4, 128, %s47_s8, [#allocation10]  }
  0x21   :  { %689 = dma.done.wait [#allocation7], 128  }
  0x22   :  { %690 = vsyncadd [#allocation7], 4294967168 }
  0x23   :  { %691 = dma.done.wait [#allocation10], 256  }
  0x24   :  { %692 = vsyncadd [#allocation10], 4294967040  ;;  %v698_v0 = vmov 0.0   ;;  %vm699_vm0 = vmmov 0   ;;  %v63_v1 = vld [vmem:[#allocation6] sm:$0xff]  ;;  %vm72_vm1 = vcmask 261120   ;;  %v176_v26 = vlaneseq }
  0x25   :  { %556 = vmatprep.subr.mxu0 %v698_v0  ;;  %561 = vmatprep.subr.mxu1 %v698_v0  ;;  %v64_v2 = vld [vmem:[#allocation9] sm:$0xff]  ;;  %v65_v3 = vld [vmem:[#allocation11] sm:$0xff]  ;;  %v71_v4 = vmul.f32 %v63_v1, %v63_v1  ;;  %v700_v13 = vmov 0   ;;  %vm76_vm2 = vcmask 7168   ;;  %v206_v57 = vstv %s774_s0  ;;  %s701_s0 = smov [#allocation12]  }
  0x26   :  { %558 = vmatprep.mubr.msk.f32.mxu0 %vm699_vm0, %v698_v0  ;;  %563 = vmatprep.mubr.msk.f32.mxu1 %vm699_vm0, %v698_v0  ;;  %v78_v5 = vmul.f32 %v64_v2, %v64_v2  ;;  %v66_v6 = vld [vmem:[%s779_s5] sm:$0xff]  ;;  %v83_v7 = vmul.f32 %v65_v3, %v65_v3  ;;  %v177_v28 = vand.u32 127, %v176_v26  ;;  %v179_v29 = vshrl.u32 %v176_v26, 7 }
  0x27   :  { %557 = vmatpush3.xpose.msk.msra.mxu0 %vm72_vm1, %v65_v3  ;;  %562 = vmatpush3.xpose.msk.msra.mxu1 %vm72_vm1, %v66_v6  ;;  %v73_v8 = vsel %vm72_vm1, %v71_v4, 0.0  ;;  %v88_v10 = vmul.f32 %v66_v6, %v66_v6  ;;  %v208_v62 = vstv %s775_s1  ;;  %s530_s1 = sshll.u32 %s701_s0, 4  ;;  %vm522_vm15 = vcmask 64512   ;;  %s531_s1 = int_to_ptr.vmem [resolvable:$true] %s530_s1 }
  0x28   :  { %566 = vmatprep.subr.mxu0 %v698_v0  ;;  %571 = vmatprep.subr.mxu1 %v698_v0  ;;  %v85_v9 = vsel %vm72_vm1, %v83_v7, 0.0  ;;  %v79_v11 = vsel %vm72_vm1, %v78_v5, 0.0  ;;  %v180_v31 = vsub.s32 %v177_v28, %v179_v29  ;;  %s669_s14 = scalar_lea.vmem %s531_s1, 128  ;;  %p674_p2 = scmp.lt.s32.totalorder %s531_s1, %s531_s1 }
  0x29   :  { %74 = vadd.xlane.f32.xlu0 %v73_v8  ;;  %86 = vadd.xlane.f32.xlu1 %v85_v9  ;;  %v89_v12 = vsel %vm72_vm1, %v88_v10, 0.0  ;;  %p670_p1 = scmp.ne.s32.totalorder %s531_s1, %s669_s14  ;;  %p675_p3 = scmp.lt.s32.totalorder %s669_s14, %s669_s14 }
  0x2a   :  { %559 = vmatmul.mubr.msk.f32.vlgmr.msra.gmra.mxu0 %vm72_vm1, %v63_v1  ;;  %564 = vmatmul.mubr.msk.f32.vlgmr.msra.gmra.mxu1 %vm72_vm1, %v63_v1 }
  0x2b   :  { %567 = vmatpush3.xpose.msk.msra.mxu0 %vm72_vm1, %v65_v3  ;;  %568 = vmatprep.mubr.msk.f32.mxu0 %vm699_vm0, %v698_v0  ;;  %p676_p4 = por %p675_p3, %p674_p2 }
  0x2c   :  { %572 = vmatpush3.xpose.msk.msra.mxu1 %vm72_vm1, %v66_v6  ;;  %573 = vmatprep.mubr.msk.f32.mxu1 %vm699_vm0, %v698_v0 }
  0x2d   :  { %80 = vadd.xlane.f32.xlu0 %v79_v11  ;;  %90 = vadd.xlane.f32.xlu1 %v89_v12  ;;  %p677_p5 = pnand %p676_p4, %p670_p1 }
  0x2e   :  { %569 = vmatmul.mubr.msk.f32.vlgmr.msra.gmra.mxu0 %vm72_vm1, %v64_v2  ;;  %583 = vset.pattern.permute.xlu0 %v700_v13 }
  0x2f   :  { %574 = vmatmul.mubr.msk.f32.vlgmr.msra.gmra.mxu1 %vm72_vm1, %v64_v2  ;;  %584 = vset.pattern.permute.xlu1 %v700_v13 }
  0xb2   :  { %v75_v14 = vpop.xlane.xlu0 %74  ;;  %v87_v27 = vpop.xlane.xlu1 %86 }
  0xb3   :  { %77 = vst.msk [vmem:[#allocation2] sm:$0xff] %vm76_vm2, %v75_v14  ;;  %v181_v33 = vrot.slane %v87_v27, %v180_v31 }
  0xb6   :  { %v81_v15 = vpop.xlane.xlu0 %80  ;;  %v91_v30 = vpop.xlane.xlu1 %90 }
  0xb7   :  { %82 = vst.msk [vmem:[#allocation3] sm:$0xff] %vm76_vm2, %v81_v15  ;;  %v296_v32 = vrot.slane %v91_v30, %v180_v31 }
  0xba   :  { %v92_v16 = vld [vmem:[#allocation2] sm:$0xff] }
  0xbb   :  { %172 = vperm.xlu0 %583, %v92_v16  }
  0xbe   :  { %v93_v17 = vld [vmem:[#allocation3] sm:$0xff] }
  0xbf   :  { %402 = vperm.xlu1 %584, %v93_v17  }
  0xea   :  { %v166_v18 = vpop.f32.mrf.mxu0  ;;  %v288_v19 = vpop.f32.mrf.mxu1 }
  0xeb   :  { %v196_v34 = vmul.f32 2.0, %v166_v18  ;;  %v305_v35 = vmul.f32 2.0, %v288_v19 }
  0xec   :  { %v560_v20 = vpop.f32.mrf.mxu0  ;;  %v565_v21 = vpop.f32.mrf.mxu1 }
  0xee   :  { %v396_v22 = vpop.f32.mrf.mxu0 }
  0xef   :  { %v494_v23 = vpop.f32.mrf.mxu1  ;;  %v406_v41 = vmul.f32 2.0, %v396_v22 }
  0xf0   :  { %v570_v24 = vpop.f32.mrf.mxu0  ;;  %v499_v42 = vmul.f32 2.0, %v494_v23 }
  0xf1   :  { %v575_v25 = vpop.f32.mrf.mxu1 }
 0x136   :  { %v173_v36 = vpop.permute.xlu0 %172 }
 0x137   :  { %v195_v37 = vadd.f32 %v181_v33, %v173_v36  ;;  %v304_v38 = vadd.f32 %v296_v32, %v173_v36 }
 0x139   :  { %v197_v39 = vsub.f32 %v195_v37, %v196_v34  ;;  %v306_v40 = vsub.f32 %v304_v38, %v305_v35 }
 0x13a   :  { %v403_v43 = vpop.permute.xlu1 %402 }
 0x13b   :  { %v198_v44 = vmax.f32 %v197_v39, 0.0  ;;  %v307_v45 = vmax.f32 %v306_v40, 0.0  ;;  %v405_v46 = vadd.f32 %v403_v43, %v181_v33  ;;  %v498_v47 = vadd.f32 %v403_v43, %v296_v32 }
 0x13d   :  { %585 = vrsqrt.f32 %v198_v44  ;;  %v407_v48 = vsub.f32 %v405_v46, %v406_v41  ;;  %v500_v49 = vsub.f32 %v498_v47, %v499_v42  ;;  %vm201_vm3 = vcmp.eq.f32.partialorder %v198_v44, inf }
 0x13e   :  { %587 = vrsqrt.f32 %v307_v45  ;;  %v204_v55 = vand.u32 2147483648, %v198_v44  ;;  %vm203_vm4 = vcmp.eq.f32.partialorder %v198_v44, 0.0  ;;  %vm310_vm5 = vcmp.eq.f32.partialorder %v307_v45, inf }
 0x13f   :  { %v408_v50 = vmax.f32 %v407_v48, 0.0  ;;  %v501_v51 = vmax.f32 %v500_v49, 0.0  ;;  %v313_v59 = vand.u32 2147483648, %v307_v45  ;;  %vm312_vm6 = vcmp.eq.f32.partialorder %v307_v45, 0.0 }
 0x141   :  { %589 = vrsqrt.f32 %v408_v50  ;;  %vm411_vm7 = vcmp.eq.f32.partialorder %v408_v50, inf  ;;  %v414_v6 = vand.u32 2147483648, %v408_v50  ;;  %vm413_vm8 = vcmp.eq.f32.partialorder %v408_v50, 0.0 }
 0x142   :  { %591 = vrsqrt.f32 %v501_v51  ;;  %vm504_vm9 = vcmp.eq.f32.partialorder %v501_v51, inf  ;;  %v507_v11 = vand.u32 2147483648, %v501_v51  ;;  %vm506_vm10 = vcmp.eq.f32.partialorder %v501_v51, 0.0 }
 0x14a   :  { %v586_v52 = vpop.eup %585 }
 0x14b   :  { %v588_v53 = vpop.eup %587  ;;  %v200_v54 = vmul.f32 %v586_v52, %v198_v44 }
 0x14c   :  { %v309_v56 = vmul.f32 %v588_v53, %v307_v45 }
 0x14d   :  { %v202_v58 = vsel %vm201_vm3, %v198_v44, %v200_v54 }
 0x14e   :  { %v311_v60 = vsel %vm310_vm5, %v307_v45, %v309_v56  ;;  %v205_v61 = vsel %vm203_vm4, %v204_v55, %v202_v58  ;;  %v590_v1 = vpop.eup %589 }
 0x14f   :  { %v207_v63 = vmul.f32 %v206_v57, %v205_v61  ;;  %v314_v0 = vsel %vm312_vm6, %v313_v59, %v311_v60  ;;  %v592_v3 = vpop.eup %591  ;;  %v410_v4 = vmul.f32 %v590_v1, %v408_v50 }
 0x150   :  { %v315_v2 = vmul.f32 %v314_v0, %v206_v57  ;;  %v503_v7 = vmul.f32 %v592_v3, %v501_v51 }
 0x151   :  { %v209_v5 = vadd.f32 %v208_v62, %v207_v63  ;;  %v412_v10 = vsel %vm411_vm7, %v408_v50, %v410_v4 }
 0x152   :  { %v316_v8 = vadd.f32 %v315_v2, %v208_v62  ;;  %v415_v13 = vsel %vm413_vm8, %v414_v6, %v412_v10  ;;  %v505_v14 = vsel %vm504_vm9, %v501_v51, %v503_v7 }
 0x153   :  { %v210_v9 = vand.u32 2147483647, %v209_v5  ;;  %v416_v16 = vmul.f32 %v415_v13, %v206_v57  ;;  %v508_v17 = vsel %vm506_vm10, %v507_v11, %v505_v14  ;;  %vm214_vm11 = vcmp.ge.f32.partialorder %v209_v5, 0.0 }
 0x154   :  { %v317_v12 = vand.u32 2147483647, %v316_v8  ;;  %v509_v19 = vmul.f32 %v508_v17, %v206_v57  ;;  %vm321_vm12 = vcmp.ge.f32.partialorder %v316_v8, 0.0 }
 0x155   :  { %v211_v15 = vsub.f32 0.0, %v210_v9  ;;  %v417_v21 = vadd.f32 %v416_v16, %v208_v62 }
 0x156   :  { %v318_v18 = vsub.f32 0.0, %v317_v12  ;;  %v510_v23 = vadd.f32 %v509_v19, %v208_v62 }
 0x157   :  { %v212_v20 = vmul.f32 1.442695, %v211_v15  ;;  %v418_v24 = vand.u32 2147483647, %v417_v21  ;;  %vm422_vm13 = vcmp.ge.f32.partialorder %v417_v21, 0.0 }
 0x158   :  { %v319_v22 = vmul.f32 1.442695, %v318_v18  ;;  %v511_v25 = vand.u32 2147483647, %v510_v23  ;;  %vm515_vm14 = vcmp.ge.f32.partialorder %v510_v23, 0.0 }
 0x159   :  { %593 = vpow2.f32 %v212_v20  ;;  %v419_v26 = vsub.f32 0.0, %v418_v24 }
 0x15a   :  { %595 = vpow2.f32 %v319_v22  ;;  %v512_v27 = vsub.f32 0.0, %v511_v25 }
 0x15b   :  { %v420_v28 = vmul.f32 1.442695, %v419_v26 }
 0x15c   :  { %v513_v29 = vmul.f32 1.442695, %v512_v27 }
 0x15d   :  { %597 = vpow2.f32 %v420_v28 }
 0x15e   :  { %599 = vpow2.f32 %v513_v29 }
 0x166   :  { %v594_v30 = vpop.eup %593 }
 0x167   :  { %v596_v31 = vpop.eup %595  ;;  %v216_v32 = vadd.f32 1.0, %v594_v30  ;;  %v215_v39 = vsel %vm214_vm11, 1.0, %v594_v30 }
 0x168   :  { %v323_v33 = vadd.f32 1.0, %v596_v31  ;;  %v322_v42 = vsel %vm321_vm12, 1.0, %v596_v31 }
 0x169   :  { %601 = vrcp.f32 %v216_v32 }
 0x16a   :  { %603 = vrcp.f32 %v323_v33  ;;  %v598_v34 = vpop.eup %597 }
 0x16b   :  { %v600_v35 = vpop.eup %599  ;;  %v424_v36 = vadd.f32 1.0, %v598_v34  ;;  %v423_v46 = vsel %vm422_vm13, 1.0, %v598_v34 }
 0x16c   :  { %v517_v37 = vadd.f32 1.0, %v600_v35  ;;  %v516_v49 = vsel %vm515_vm14, 1.0, %v600_v35 }
 0x16d   :  { %605 = vrcp.f32 %v424_v36 }
 0x16e   :  { %607 = vrcp.f32 %v517_v37 }
 0x176   :  { %v602_v38 = vpop.eup %601 }
 0x177   :  { %v604_v40 = vpop.eup %603  ;;  %v218_v41 = vmul.f32 %v602_v38, %v215_v39 }
 0x178   :  { %v325_v43 = vmul.f32 %v604_v40, %v322_v42 }
 0x17a   :  { %v326_v44 = vadd.f32 %v325_v43, %v218_v41  ;;  %v606_v45 = vpop.eup %605 }
 0x17b   :  { %v608_v47 = vpop.eup %607  ;;  %v426_v48 = vmul.f32 %v606_v45, %v423_v46 }
 0x17c   :  { %v519_v51 = vmul.f32 %v608_v47, %v516_v49 }
 0x17d   :  { %v427_v50 = vadd.f32 %v426_v48, %v326_v44 }
 0x17f   :  { %v520_v52 = vadd.f32 %v519_v51, %v427_v50 }
 0x181   :  { %v521_v53 = vmul.f32 0.25, %v520_v52 }
 0x183   :  { %523 = vst.msk [vmem:[#allocation12] sm:$0xff] %vm522_vm15, %v521_v53 }
 0x184   :  { %680 = shalt.err (!%p677_p5)
}
 0x185   :  { %533 = dma.vmem_to_hbm [thread:$0]  %s531_s1, 128, %s780_s6, [#allocation8]  }
 0x186   :  { %693 = dma.done.wait [#allocation8], 128  }
 0x187   :  { %694 = vsyncadd [#allocation8], 4294967168 }
 0x188   :  { %537 = vsyncpa [#allocation7], 1 }
 0x189   :  { %538 = vsyncpa [#allocation10], 1 }
 0x18a   :  { %539 = vsyncpa [#allocation8], 1 }

</bundles_post_ra>
